<compile_context>
chip_gen: v5e
topology: v5e:2x2
jax: 0.10.0
libtpu: 0.0.40
codegen_flags: <defaults>
</compile_context>

<pallas_src>
import jax
import jax.numpy as jnp
from jax.experimental import pallas as pl
from jax.experimental.pallas import tpu as pltpu

# per-pixel loss partials produced by the kernel (mid is derived in the wrapper)
NS = 9  # mse, l1, highlight, gradient, contrast, specular, dark, bright, large_dev

# loss weights (params.LAMBDA_* in the original script; deterministic stand-ins)
LAMBDA = {
    "mse": 1.0, "l1": 1.0, "highlight": 1.0, "gradient": 1.0, "contrast": 1.0,
    "specular": 1.0, "dark": 1.0, "mid": 1.0, "bright": 1.0, "large_dev": 1.0,
}


def combined_loss_kernel(o_ref, t_ref, part_ref, chan_ref):
    # o_ref, t_ref : VMEM [1, 1, H, W]    one (batch, channel) plane each
    # part_ref     : VMEM f32[1, NS, W]   per-term H-and-C-reduced partial sums
    #                (resident across the C grid axis -> accumulator)
    # chan_ref     : VMEM f32[1, 1, 1, W] per-(b,c) column sums of (o - t)
    c = pl.program_id(1)
    H, W = o_ref.shape[2], o_ref.shape[3]

    o = o_ref[0, 0].astype(jnp.float32)      # (H, W)
    t = t_ref[0, 0].astype(jnp.float32)      # (H, W)

    zrow = jnp.zeros((1, W), jnp.float32)
    zcol = jnp.zeros((H, 1), jnp.float32)

    # zero-padded unit shifts built in-register (no pad-scratch round trip)
    def left(x):   # x[i, j + 1], 0 at the last column
        return jnp.concatenate([x[:, 1:], zcol], axis=1)

    def right(x):  # x[i, j - 1], 0 at the first column
        return jnp.concatenate([zcol, x[:, :-1]], axis=1)

    def below(x):  # x[i + 1, j], 0 at the last row
        return jnp.concatenate([x[1:, :], zrow], axis=0)

    def above(x):  # x[i - 1, j], 0 at the first row
        return jnp.concatenate([zrow, x[:-1, :]], axis=0)

    d = o - t
    d2 = d * d
    ad = jnp.abs(d)

    # ---- separable 3x3: horizontal passes shared by Sobel / box / max ------
    o_l, o_r = left(o), right(o)
    t_l, t_r = left(t), right(t)
    o_hd = o_l - o_r                       # horizontal [-1, 0, 1]
    t_hd = t_l - t_r
    o_hs = o_l + o_r + 2.0 * o             # horizontal [ 1, 2, 1]
    t_hs = t_l + t_r + 2.0 * t
    o_h3 = o_l + o_r + o                   # horizontal [ 1, 1, 1]
    t_h3 = t_l + t_r + t
    t_hm = jnp.maximum(jnp.maximum(t_l, t_r), t)

    # ---- vertical passes ----------------------------------------------------
    gx_o = above(o_hd) + 2.0 * o_hd + below(o_hd)
    gy_o = below(o_hs) - above(o_hs)
    gx_t = above(t_hd) + 2.0 * t_hd + below(t_hd)
    gy_t = below(t_hs) - above(t_hs)
    grad_d = (jnp.sqrt(gx_o * gx_o + gy_o * gy_o)
              - jnp.sqrt(gx_t * gx_t + gy_t * gy_t))

    box_d = ((above(o_h3) + o_h3 + below(o_h3))
             - (above(t_h3) + t_h3 + below(t_h3)))
    con_d = d - box_d * (1.0 / 9.0)        # count_include_pad avg pool (/9)

    # zero pad == -inf pad here because target >= 0 and the centre pixel is in
    # its own window.  TODO(synk): use a -inf pad if targets can be negative.
    t_max = jnp.maximum(jnp.maximum(above(t_hm), below(t_hm)), t_hm)

    terms = (
        d2,                                   # mse
        ad,                                   # l1
        jnp.where(t > 0.7, d2, 0.0),          # highlight
        grad_d * grad_d,                      # gradient
        con_d * con_d,                        # contrast
        jnp.where(t > 0.8 * t_max, d2, 0.0),  # specular
        jnp.where(t <= 0.2, d2, 0.0),         # dark
        jnp.where(t >= 0.8, d2, 0.0),         # bright      (x2 in wrapper)
        jnp.where(ad > 0.1, d2, 0.0),         # large_dev   (x2 in wrapper)
    )
    # reduce each term over H right away; a single (NS, W) accumulate per step
    rows = jnp.concatenate(
        [jnp.sum(v, axis=0, keepdims=True) for v in terms], axis=0)

    @pl.when(c == 0)
    def _init():
        part_ref[...] = jnp.zeros_like(part_ref)

    part_ref[...] += rows[None]

    # per-(b, c) column sums of (o - t) -> intensity loss finished in wrapper
    chan_ref[0, 0] = jnp.sum(d, axis=0, keepdims=True)


def combined_loss(output, target, *, input_channels=4, use_perceptual=False):
    """Pallas implementation of CombinedLoss.forward (use_perceptual=False)."""
    if use_perceptual:
        # TODO(synk): VGG16 perceptual loss needs pretrained weights; unsupported.
        raise NotImplementedError("perceptual loss requires pretrained VGG16")

    # mirrors the PyTorch NHWC -> NCHW heuristic
    if output.ndim == 4 and output.shape[-1] == input_channels:
        output = jnp.transpose(output, (0, 3, 1, 2))
        target = jnp.transpose(target, (0, 3, 1, 2))
    B, C, H, W = output.shape

    # stream bf16/f32 as-is (no wrapper up-cast); cast to f32 inside the kernel
    if not jnp.issubdtype(output.dtype, jnp.floating):
        output = output.astype(jnp.float32)
    if not jnp.issubdtype(target.dtype, jnp.floating):
        target = target.astype(jnp.float32)

    itemsize = jnp.dtype(output.dtype).itemsize
    cost = pl.CostEstimate(
        flops=int(70 * B * C * H * W),
        transcendentals=int(2 * B * C * H * W),
        bytes_accessed=int(B * C * H * W
                           * (itemsize + jnp.dtype(target.dtype).itemsize)
                           + (B * NS * W + B * C * W) * 4),
    )
    vmem_limit = int(min(100 * 1024 * 1024,
                         max(32 * 1024 * 1024,
                             6 * H * W * itemsize + (2 << 20))))

    part, chan = pl.pallas_call(
        combined_loss_kernel,
        out_shape=[
            jax.ShapeDtypeStruct((B, NS, W), jnp.float32),
            jax.ShapeDtypeStruct((B, C, 1, W), jnp.float32),
        ],
        grid=(B, C),
        in_specs=[
            pl.BlockSpec((1, 1, H, W), lambda b, c: (b, c, 0, 0)),
            pl.BlockSpec((1, 1, H, W), lambda b, c: (b, c, 0, 0)),
        ],
        out_specs=[
            pl.BlockSpec((1, NS, W), lambda b, c: (b, 0, 0)),
            pl.BlockSpec((1, 1, 1, W), lambda b, c: (b, c, 0, 0)),
        ],
        compiler_params=pltpu.CompilerParams(
            dimension_semantics=("parallel", "arbitrary"),
            vmem_limit_bytes=vmem_limit),
        cost_estimate=cost,
    )(output, target)

    n = float(B * C * H * W)
    sums = jnp.sum(part, axis=(0, 2))                 # (NS,)
    losses = {
        "mse": sums[0] / n,
        "l1": sums[1] / n,
        "highlight": sums[2] / n,
        "gradient": sums[3] / n,
        "contrast": sums[4] / n,
        "specular": sums[5] / n,
        "dark": sums[6] / n,
        # dark / mid / bright exactly partition [0, 1] -> derive mid for free
        "mid": (sums[0] - sums[6] - sums[7]) / n,
        "bright": 2.0 * sums[7] / n,
        "large_dev": 2.0 * sums[8] / n,
    }

    mean_diff = jnp.sum(chan, axis=(2, 3)) / float(H * W)   # (B, C)
    losses["intensity"] = jnp.mean(mean_diff ** 2)

    total = (LAMBDA["mse"] * losses["mse"]
             + LAMBDA["l1"] * losses["l1"]
             + LAMBDA["highlight"] * losses["highlight"]
             + LAMBDA["gradient"] * losses["gradient"]
             + LAMBDA["contrast"] * losses["contrast"]
             + LAMBDA["specular"] * losses["specular"]
             + LAMBDA["dark"] * losses["dark"]
             + LAMBDA["mid"] * losses["mid"]
             + LAMBDA["bright"] * losses["bright"]
             + LAMBDA["large_dev"] * losses["large_dev"]
             + 5.0 * losses["intensity"])
    return total, losses


def combined_loss_ref(output, target, *, input_channels=4):
    """Pure-JAX reference mirroring the PyTorch forward (use_perceptual=False)."""
    if output.ndim == 4 and output.shape[-1] == input_channels:
        output = jnp.transpose(output, (0, 3, 1, 2))
        target = jnp.transpose(target, (0, 3, 1, 2))
    B, C, H, W = output.shape
    output = output.astype(jnp.float32)
    target = target.astype(jnp.float32)

    losses = {}
    losses["intensity"] = jnp.mean(
        (jnp.mean(output, axis=(2, 3)) - jnp.mean(target, axis=(2, 3))) ** 2)
    losses["mse"] = jnp.mean((output - target) ** 2)
    losses["l1"] = jnp.mean(jnp.abs(output - target))

    bm = (target > 0.7).astype(jnp.float32)
    losses["highlight"] = jnp.mean((output * bm - target * bm) ** 2)

    sobel_x = jnp.array([[-1, 0, 1], [-2, 0, 2], [-1, 0, 1]], jnp.float32)
    sobel_y = jnp.array([[-1, -2, -1], [0, 0, 0], [1, 2, 1]], jnp.float32)

    def sobel_grad(x):
        wx = jnp.tile(sobel_x[None, None], (C, 1, 1, 1))
        wy = jnp.tile(sobel_y[None, None], (C, 1, 1, 1))
        kw = dict(window_strides=(1, 1), padding=[(1, 1), (1, 1)],
                  dimension_numbers=("NCHW", "OIHW", "NCHW"),
                  feature_group_count=C)
        gx = jax.lax.conv_general_dilated(x, wx, **kw)
        gy = jax.lax.conv_general_dilated(x, wy, **kw)
        return jnp.sqrt(gx ** 2 + gy ** 2)

    losses["gradient"] = jnp.mean((sobel_grad(output) - sobel_grad(target)) ** 2)

    pad = [(0, 0), (0, 0), (1, 1), (1, 1)]

    def avg_pool3(x):
        return jax.lax.reduce_window(x, 0.0, jax.lax.add,
                                     (1, 1, 3, 3), (1, 1, 1, 1), pad) / 9.0

    oc = output - avg_pool3(output)
    tc = target - avg_pool3(target)
    losses["contrast"] = jnp.mean((oc - tc) ** 2)

    mp = jax.lax.reduce_window(target, -jnp.inf, jax.lax.max,
                               (1, 1, 3, 3), (1, 1, 1, 1), pad)
    sm = (target > 0.8 * mp).astype(jnp.float32)
    losses["specular"] = jnp.mean((output * sm - target * sm) ** 2)

    dm = (target <= 0.2).astype(jnp.float32)
    losses["dark"] = jnp.mean((output * dm - target * dm) ** 2)
    mm = ((target > 0.2) & (target < 0.8)).astype(jnp.float32)
    losses["mid"] = jnp.mean((output * mm - target * mm) ** 2)
    brm = (target >= 0.8).astype(jnp.float32)
    losses["bright"] = 2.0 * jnp.mean((output * brm - target * brm) ** 2)
    ldm = (jnp.abs(output - target) > 0.1).astype(jnp.float32)
    losses["large_dev"] = 2.0 * jnp.mean((output * ldm - target * ldm) ** 2)

    total = (LAMBDA["mse"] * losses["mse"] + LAMBDA["l1"] * losses["l1"]
             + LAMBDA["highlight"] * losses["highlight"]
             + LAMBDA["gradient"] * losses["gradient"]
             + LAMBDA["contrast"] * losses["contrast"]
             + LAMBDA["specular"] * losses["specular"]
             + LAMBDA["dark"] * losses["dark"] + LAMBDA["mid"] * losses["mid"]
             + LAMBDA["bright"] * losses["bright"]
             + LAMBDA["large_dev"] * losses["large_dev"]
             + 5.0 * losses["intensity"])
    return total, losses


if __name__ == "__main__":
    key = jax.random.PRNGKey(0)
    ko, kt = jax.random.split(key)

    B, C, H, W = 2, 4, 16, 16
    output = jax.random.uniform(ko, (B, C, H, W), jnp.float32)
    target = jax.random.uniform(kt, (B, C, H, W), jnp.float32)

    total, losses = combined_loss(output, target, input_channels=C)
    total = jax.block_until_ready(total)

    total_ref, losses_ref = combined_loss_ref(output, target, input_channels=C)
    for name, ref_val in losses_ref.items():
        got = losses[name]
        assert jnp.allclose(got, ref_val, rtol=2e-3, atol=1e-5), (
            name, float(got), float(ref_val))
    assert jnp.allclose(total, total_ref, rtol=2e-3, atol=1e-5), (
        float(total), float(total_ref))

    print("KERNEL_OK")
</pallas_src>

<mosaic_0001>
module attributes {stable_mosaic.version = 11 : i64} {
  func.func @combined_loss_kernel(%arg0: i32, %arg1: i32, %arg2: memref<1x1x16x16xf32, #tpu.memory_space<vmem>>, %arg3: memref<1x1x16x16xf32, #tpu.memory_space<vmem>>, %arg4: memref<1x9x16xf32, #tpu.memory_space<vmem>>, %arg5: memref<1x1x1x16xf32, #tpu.memory_space<vmem>>) attributes {dimension_semantics = [#tpu.dimension_semantics<parallel>, #tpu.dimension_semantics<arbitrary>], iteration_bounds = array<i64: 2, 4>, scalar_prefetch = 0 : i64, scratch_operands = 0 : i64, tpu.core_type = #tpu.core_type<tc>, window_params = [{transform_indices = @transform_0, window_bounds = array<i64: 1, 1, 16, 16>}, {transform_indices = @transform_1, window_bounds = array<i64: 1, 1, 16, 16>}, {transform_indices = @transform_2, window_bounds = array<i64: 1, 9, 16>}, {transform_indices = @transform_3, window_bounds = array<i64: 1, 1, 1, 16>}]} {
    %c0 = arith.constant 0 : index
    %c0_0 = arith.constant 0 : index
    %c0_1 = arith.constant 0 : index
    %c0_2 = arith.constant 0 : index
    %0 = vector.load %arg2[%c0, %c0_0, %c0_1, %c0_2] : memref<1x1x16x16xf32, #tpu.memory_space<vmem>>, vector<1x1x16x16xf32>
    %1 = vector.shape_cast %0 : vector<1x1x16x16xf32> to vector<16x16xf32>
    %c0_3 = arith.constant 0 : index
    %c0_4 = arith.constant 0 : index
    %c0_5 = arith.constant 0 : index
    %c0_6 = arith.constant 0 : index
    %2 = vector.load %arg3[%c0_3, %c0_4, %c0_5, %c0_6] : memref<1x1x16x16xf32, #tpu.memory_space<vmem>>, vector<1x1x16x16xf32>
    %3 = vector.shape_cast %2 : vector<1x1x16x16xf32> to vector<16x16xf32>
    %cst = arith.constant 0.000000e+00 : f32
    %4 = vector.broadcast %cst : f32 to vector<1x16xf32>
    %cst_7 = arith.constant 0.000000e+00 : f32
    %5 = vector.broadcast %cst_7 : f32 to vector<16x1xf32>
    %6 = arith.subf %1, %3 : vector<16x16xf32>
    %7 = arith.mulf %6, %6 : vector<16x16xf32>
    %8 = math.absf %6 : vector<16x16xf32>
    %9 = vector.extract_strided_slice %1 {offsets = [0, 1], sizes = [16, 15], strides = [1, 1]} : vector<16x16xf32> to vector<16x15xf32>
    %10 = tpu.concatenate %9, %5 in 1 : vector<16x15xf32>, vector<16x1xf32> -> vector<16x16xf32>
    %11 = vector.extract_strided_slice %1 {offsets = [0, 0], sizes = [16, 15], strides = [1, 1]} : vector<16x16xf32> to vector<16x15xf32>
    %12 = tpu.concatenate %5, %11 in 1 : vector<16x1xf32>, vector<16x15xf32> -> vector<16x16xf32>
    %13 = vector.extract_strided_slice %3 {offsets = [0, 1], sizes = [16, 15], strides = [1, 1]} : vector<16x16xf32> to vector<16x15xf32>
    %14 = tpu.concatenate %13, %5 in 1 : vector<16x15xf32>, vector<16x1xf32> -> vector<16x16xf32>
    %15 = vector.extract_strided_slice %3 {offsets = [0, 0], sizes = [16, 15], strides = [1, 1]} : vector<16x16xf32> to vector<16x15xf32>
    %16 = tpu.concatenate %5, %15 in 1 : vector<16x1xf32>, vector<16x15xf32> -> vector<16x16xf32>
    %17 = arith.subf %10, %12 : vector<16x16xf32>
    %18 = arith.subf %14, %16 : vector<16x16xf32>
    %19 = arith.addf %10, %12 : vector<16x16xf32>
    %cst_8 = arith.constant 2.000000e+00 : f32
    %20 = vector.broadcast %cst_8 : f32 to vector<16x16xf32>
    %21 = arith.mulf %20, %1 : vector<16x16xf32>
    %22 = arith.addf %19, %21 : vector<16x16xf32>
    %23 = arith.addf %14, %16 : vector<16x16xf32>
    %cst_9 = arith.constant 2.000000e+00 : f32
    %24 = vector.broadcast %cst_9 : f32 to vector<16x16xf32>
    %25 = arith.mulf %24, %3 : vector<16x16xf32>
    %26 = arith.addf %23, %25 : vector<16x16xf32>
    %27 = arith.addf %10, %12 : vector<16x16xf32>
    %28 = arith.addf %27, %1 : vector<16x16xf32>
    %29 = arith.addf %14, %16 : vector<16x16xf32>
    %30 = arith.addf %29, %3 : vector<16x16xf32>
    %31 = arith.maximumf %14, %16 : vector<16x16xf32>
    %32 = arith.maximumf %31, %3 : vector<16x16xf32>
    %33 = vector.extract_strided_slice %17 {offsets = [0, 0], sizes = [15, 16], strides = [1, 1]} : vector<16x16xf32> to vector<15x16xf32>
    %34 = tpu.concatenate %4, %33 in 0 : vector<1x16xf32>, vector<15x16xf32> -> vector<16x16xf32>
    %cst_10 = arith.constant 2.000000e+00 : f32
    %35 = vector.broadcast %cst_10 : f32 to vector<16x16xf32>
    %36 = arith.mulf %35, %17 : vector<16x16xf32>
    %37 = arith.addf %34, %36 : vector<16x16xf32>
    %38 = vector.extract_strided_slice %17 {offsets = [1, 0], sizes = [15, 16], strides = [1, 1]} : vector<16x16xf32> to vector<15x16xf32>
    %39 = tpu.concatenate %38, %4 in 0 : vector<15x16xf32>, vector<1x16xf32> -> vector<16x16xf32>
    %40 = arith.addf %37, %39 : vector<16x16xf32>
    %41 = vector.extract_strided_slice %22 {offsets = [1, 0], sizes = [15, 16], strides = [1, 1]} : vector<16x16xf32> to vector<15x16xf32>
    %42 = tpu.concatenate %41, %4 in 0 : vector<15x16xf32>, vector<1x16xf32> -> vector<16x16xf32>
    %43 = vector.extract_strided_slice %22 {offsets = [0, 0], sizes = [15, 16], strides = [1, 1]} : vector<16x16xf32> to vector<15x16xf32>
    %44 = tpu.concatenate %4, %43 in 0 : vector<1x16xf32>, vector<15x16xf32> -> vector<16x16xf32>
    %45 = arith.subf %42, %44 : vector<16x16xf32>
    %46 = vector.extract_strided_slice %18 {offsets = [0, 0], sizes = [15, 16], strides = [1, 1]} : vector<16x16xf32> to vector<15x16xf32>
    %47 = tpu.concatenate %4, %46 in 0 : vector<1x16xf32>, vector<15x16xf32> -> vector<16x16xf32>
    %cst_11 = arith.constant 2.000000e+00 : f32
    %48 = vector.broadcast %cst_11 : f32 to vector<16x16xf32>
    %49 = arith.mulf %48, %18 : vector<16x16xf32>
    %50 = arith.addf %47, %49 : vector<16x16xf32>
    %51 = vector.extract_strided_slice %18 {offsets = [1, 0], sizes = [15, 16], strides = [1, 1]} : vector<16x16xf32> to vector<15x16xf32>
    %52 = tpu.concatenate %51, %4 in 0 : vector<15x16xf32>, vector<1x16xf32> -> vector<16x16xf32>
    %53 = arith.addf %50, %52 : vector<16x16xf32>
    %54 = vector.extract_strided_slice %26 {offsets = [1, 0], sizes = [15, 16], strides = [1, 1]} : vector<16x16xf32> to vector<15x16xf32>
    %55 = tpu.concatenate %54, %4 in 0 : vector<15x16xf32>, vector<1x16xf32> -> vector<16x16xf32>
    %56 = vector.extract_strided_slice %26 {offsets = [0, 0], sizes = [15, 16], strides = [1, 1]} : vector<16x16xf32> to vector<15x16xf32>
    %57 = tpu.concatenate %4, %56 in 0 : vector<1x16xf32>, vector<15x16xf32> -> vector<16x16xf32>
    %58 = arith.subf %55, %57 : vector<16x16xf32>
    %59 = arith.mulf %40, %40 : vector<16x16xf32>
    %60 = arith.mulf %45, %45 : vector<16x16xf32>
    %61 = arith.addf %59, %60 : vector<16x16xf32>
    %62 = math.sqrt %61 : vector<16x16xf32>
    %63 = arith.mulf %53, %53 : vector<16x16xf32>
    %64 = arith.mulf %58, %58 : vector<16x16xf32>
    %65 = arith.addf %63, %64 : vector<16x16xf32>
    %66 = math.sqrt %65 : vector<16x16xf32>
    %67 = arith.subf %62, %66 : vector<16x16xf32>
    %68 = vector.extract_strided_slice %28 {offsets = [0, 0], sizes = [15, 16], strides = [1, 1]} : vector<16x16xf32> to vector<15x16xf32>
    %69 = tpu.concatenate %4, %68 in 0 : vector<1x16xf32>, vector<15x16xf32> -> vector<16x16xf32>
    %70 = arith.addf %69, %28 : vector<16x16xf32>
    %71 = vector.extract_strided_slice %28 {offsets = [1, 0], sizes = [15, 16], strides = [1, 1]} : vector<16x16xf32> to vector<15x16xf32>
    %72 = tpu.concatenate %71, %4 in 0 : vector<15x16xf32>, vector<1x16xf32> -> vector<16x16xf32>
    %73 = arith.addf %70, %72 : vector<16x16xf32>
    %74 = vector.extract_strided_slice %30 {offsets = [0, 0], sizes = [15, 16], strides = [1, 1]} : vector<16x16xf32> to vector<15x16xf32>
    %75 = tpu.concatenate %4, %74 in 0 : vector<1x16xf32>, vector<15x16xf32> -> vector<16x16xf32>
    %76 = arith.addf %75, %30 : vector<16x16xf32>
    %77 = vector.extract_strided_slice %30 {offsets = [1, 0], sizes = [15, 16], strides = [1, 1]} : vector<16x16xf32> to vector<15x16xf32>
    %78 = tpu.concatenate %77, %4 in 0 : vector<15x16xf32>, vector<1x16xf32> -> vector<16x16xf32>
    %79 = arith.addf %76, %78 : vector<16x16xf32>
    %80 = arith.subf %73, %79 : vector<16x16xf32>
    %cst_12 = arith.constant 0.111111112 : f32
    %81 = vector.broadcast %cst_12 : f32 to vector<16x16xf32>
    %82 = arith.mulf %80, %81 : vector<16x16xf32>
    %83 = arith.subf %6, %82 : vector<16x16xf32>
    %84 = vector.extract_strided_slice %32 {offsets = [0, 0], sizes = [15, 16], strides = [1, 1]} : vector<16x16xf32> to vector<15x16xf32>
    %85 = tpu.concatenate %4, %84 in 0 : vector<1x16xf32>, vector<15x16xf32> -> vector<16x16xf32>
    %86 = vector.extract_strided_slice %32 {offsets = [1, 0], sizes = [15, 16], strides = [1, 1]} : vector<16x16xf32> to vector<15x16xf32>
    %87 = tpu.concatenate %86, %4 in 0 : vector<15x16xf32>, vector<1x16xf32> -> vector<16x16xf32>
    %88 = arith.maximumf %85, %87 : vector<16x16xf32>
    %89 = arith.maximumf %88, %32 : vector<16x16xf32>
    %cst_13 = arith.constant 0.699999988 : f32
    %90 = vector.broadcast %cst_13 : f32 to vector<16x16xf32>
    %91 = arith.cmpf ogt, %3, %90 : vector<16x16xf32>
    %cst_14 = arith.constant 0.000000e+00 : f32
    %92 = vector.broadcast %cst_14 : f32 to vector<16x16xf32>
    %93 = arith.select %91, %7, %92 : vector<16x16xi1>, vector<16x16xf32>
    %94 = arith.mulf %67, %67 : vector<16x16xf32>
    %95 = arith.mulf %83, %83 : vector<16x16xf32>
    %cst_15 = arith.constant 8.000000e-01 : f32
    %96 = vector.broadcast %cst_15 : f32 to vector<16x16xf32>
    %97 = arith.mulf %96, %89 : vector<16x16xf32>
    %98 = arith.cmpf ogt, %3, %97 : vector<16x16xf32>
    %cst_16 = arith.constant 0.000000e+00 : f32
    %99 = vector.broadcast %cst_16 : f32 to vector<16x16xf32>
    %100 = arith.select %98, %7, %99 : vector<16x16xi1>, vector<16x16xf32>
    %cst_17 = arith.constant 2.000000e-01 : f32
    %101 = vector.broadcast %cst_17 : f32 to vector<16x16xf32>
    %102 = arith.cmpf ole, %3, %101 : vector<16x16xf32>
    %cst_18 = arith.constant 0.000000e+00 : f32
    %103 = vector.broadcast %cst_18 : f32 to vector<16x16xf32>
    %104 = arith.select %102, %7, %103 : vector<16x16xi1>, vector<16x16xf32>
    %cst_19 = arith.constant 8.000000e-01 : f32
    %105 = vector.broadcast %cst_19 : f32 to vector<16x16xf32>
    %106 = arith.cmpf oge, %3, %105 : vector<16x16xf32>
    %cst_20 = arith.constant 0.000000e+00 : f32
    %107 = vector.broadcast %cst_20 : f32 to vector<16x16xf32>
    %108 = arith.select %106, %7, %107 : vector<16x16xi1>, vector<16x16xf32>
    %cst_21 = arith.constant 1.000000e-01 : f32
    %109 = vector.broadcast %cst_21 : f32 to vector<16x16xf32>
    %110 = arith.cmpf ogt, %8, %109 : vector<16x16xf32>
    %cst_22 = arith.constant 0.000000e+00 : f32
    %111 = vector.broadcast %cst_22 : f32 to vector<16x16xf32>
    %112 = arith.select %110, %7, %111 : vector<16x16xi1>, vector<16x16xf32>
    %cst_23 = arith.constant dense<0.000000e+00> : vector<16xf32>
    %113 = vector.multi_reduction <add>, %7, %cst_23 [0] : vector<16x16xf32> to vector<16xf32>
    %114 = vector.shape_cast %113 : vector<16xf32> to vector<1x16xf32>
    %cst_24 = arith.constant dense<0.000000e+00> : vector<16xf32>
    %115 = vector.multi_reduction <add>, %8, %cst_24 [0] : vector<16x16xf32> to vector<16xf32>
    %116 = vector.shape_cast %115 : vector<16xf32> to vector<1x16xf32>
    %cst_25 = arith.constant dense<0.000000e+00> : vector<16xf32>
    %117 = vector.multi_reduction <add>, %93, %cst_25 [0] : vector<16x16xf32> to vector<16xf32>
    %118 = vector.shape_cast %117 : vector<16xf32> to vector<1x16xf32>
    %cst_26 = arith.constant dense<0.000000e+00> : vector<16xf32>
    %119 = vector.multi_reduction <add>, %94, %cst_26 [0] : vector<16x16xf32> to vector<16xf32>
    %120 = vector.shape_cast %119 : vector<16xf32> to vector<1x16xf32>
    %cst_27 = arith.constant dense<0.000000e+00> : vector<16xf32>
    %121 = vector.multi_reduction <add>, %95, %cst_27 [0] : vector<16x16xf32> to vector<16xf32>
    %122 = vector.shape_cast %121 : vector<16xf32> to vector<1x16xf32>
    %cst_28 = arith.constant dense<0.000000e+00> : vector<16xf32>
    %123 = vector.multi_reduction <add>, %100, %cst_28 [0] : vector<16x16xf32> to vector<16xf32>
    %124 = vector.shape_cast %123 : vector<16xf32> to vector<1x16xf32>
    %cst_29 = arith.constant dense<0.000000e+00> : vector<16xf32>
    %125 = vector.multi_reduction <add>, %104, %cst_29 [0] : vector<16x16xf32> to vector<16xf32>
    %126 = vector.shape_cast %125 : vector<16xf32> to vector<1x16xf32>
    %cst_30 = arith.constant dense<0.000000e+00> : vector<16xf32>
    %127 = vector.multi_reduction <add>, %108, %cst_30 [0] : vector<16x16xf32> to vector<16xf32>
    %128 = vector.shape_cast %127 : vector<16xf32> to vector<1x16xf32>
    %cst_31 = arith.constant dense<0.000000e+00> : vector<16xf32>
    %129 = vector.multi_reduction <add>, %112, %cst_31 [0] : vector<16x16xf32> to vector<16xf32>
    %130 = vector.shape_cast %129 : vector<16xf32> to vector<1x16xf32>
    %131 = tpu.concatenate %114, %116, %118, %120, %122, %124, %126, %128, %130 in 0 : vector<1x16xf32>, vector<1x16xf32>, vector<1x16xf32>, vector<1x16xf32>, vector<1x16xf32>, vector<1x16xf32>, vector<1x16xf32>, vector<1x16xf32>, vector<1x16xf32> -> vector<9x16xf32>
    %c0_i32 = arith.constant 0 : i32
    %132 = arith.cmpi eq, %arg1, %c0_i32 : i32
    %133 = arith.extui %132 : i1 to i32
    %c0_i32_32 = arith.constant 0 : i32
    %134 = arith.cmpi ne, %133, %c0_i32_32 : i32
    scf.if %134 {
      %cst_44 = arith.constant 0.000000e+00 : f32
      %144 = vector.broadcast %cst_44 : f32 to vector<1x9x16xf32>
      %c0_45 = arith.constant 0 : index
      %c0_46 = arith.constant 0 : index
      %c0_47 = arith.constant 0 : index
      %145 = vector.load %arg4[%c0_45, %c0_46, %c0_47] : memref<1x9x16xf32, #tpu.memory_space<vmem>>, vector<1x9x16xf32>
      tpu.vector_store %arg4[%c0_45, %c0_46, %c0_47], %144 {strides = array<i32>} : memref<1x9x16xf32, #tpu.memory_space<vmem>>, vector<1x9x16xf32>,
    } else {
    }
    %c0_33 = arith.constant 0 : index
    %c0_34 = arith.constant 0 : index
    %c0_35 = arith.constant 0 : index
    %135 = vector.load %arg4[%c0_33, %c0_34, %c0_35] : memref<1x9x16xf32, #tpu.memory_space<vmem>>, vector<1x9x16xf32>
    %136 = vector.shape_cast %131 : vector<9x16xf32> to vector<1x9x16xf32>
    %137 = arith.addf %135, %136 : vector<1x9x16xf32>
    %c0_36 = arith.constant 0 : index
    %c0_37 = arith.constant 0 : index
    %c0_38 = arith.constant 0 : index
    %138 = vector.load %arg4[%c0_36, %c0_37, %c0_38] : memref<1x9x16xf32, #tpu.memory_space<vmem>>, vector<1x9x16xf32>
    tpu.vector_store %arg4[%c0_36, %c0_37, %c0_38], %137 {strides = array<i32>} : memref<1x9x16xf32, #tpu.memory_space<vmem>>, vector<1x9x16xf32>,
    %cst_39 = arith.constant dense<0.000000e+00> : vector<16xf32>
    %139 = vector.multi_reduction <add>, %6, %cst_39 [0] : vector<16x16xf32> to vector<16xf32>
    %140 = vector.shape_cast %139 : vector<16xf32> to vector<1x16xf32>
    %c0_40 = arith.constant 0 : index
    %c0_41 = arith.constant 0 : index
    %c0_42 = arith.constant 0 : index
    %c0_43 = arith.constant 0 : index
    %141 = vector.load %arg5[%c0_40, %c0_41, %c0_42, %c0_43] : memref<1x1x1x16xf32, #tpu.memory_space<vmem>>, vector<1x1x1x16xf32>
    %142 = vector.shape_cast %141 : vector<1x1x1x16xf32> to vector<1x16xf32>
    %143 = vector.shape_cast %140 : vector<1x16xf32> to vector<1x1x1x16xf32>
    tpu.vector_store %arg5[%c0_40, %c0_41, %c0_42, %c0_43], %143 {strides = array<i32>} : memref<1x1x1x16xf32, #tpu.memory_space<vmem>>, vector<1x1x1x16xf32>,
    return
  }
  func.func @transform_0(%arg0: i32, %arg1: i32) -> (i32, i32, i32, i32) {
    %c0_i32 = arith.constant 0 : i32
    %c0_i32_0 = arith.constant 0 : i32
    %c0_i32_1 = arith.constant 0 : i32
    return %arg0, %arg1, %c0_i32, %c0_i32_0 : i32, i32, i32, i32
  }
  func.func @transform_1(%arg0: i32, %arg1: i32) -> (i32, i32, i32, i32) {
    %c0_i32 = arith.constant 0 : i32
    %c0_i32_0 = arith.constant 0 : i32
    %c0_i32_1 = arith.constant 0 : i32
    return %arg0, %arg1, %c0_i32, %c0_i32_0 : i32, i32, i32, i32
  }
  func.func @transform_2(%arg0: i32, %arg1: i32) -> (i32, i32, i32) {
    %c0_i32 = arith.constant 0 : i32
    %c0_i32_0 = arith.constant 0 : i32
    %c0_i32_1 = arith.constant 0 : i32
    return %arg0, %c0_i32, %c0_i32_0 : i32, i32, i32
  }
  func.func @transform_3(%arg0: i32, %arg1: i32) -> (i32, i32, i32, i32) {
    %c0_i32 = arith.constant 0 : i32
    %c0_i32_0 = arith.constant 0 : i32
    %c0_i32_1 = arith.constant 0 : i32
    return %arg0, %arg1, %c0_i32, %c0_i32_0 : i32, i32, i32, i32
  }
}

</mosaic_0001>

<bundles_post_ra>
// kernel: tpu_custom_call.1
= control target key start
LH: loop header
LB: loop body
LE: loop exit
PB: predicated region body
PF: predicated region fallthrough
CT: control target
= control target key end

     0   :  { %s1583_s0 = inlined_call_operand.hbm [shape: f32[2,4,16,16], index: 0, kind: input, shape index: {}]   ;;  %s1584_s1 = inlined_call_operand.hbm [shape: f32[2,4,16,16], index: 1, kind: input, shape index: {}]   ;;  %s1585_s2 = inlined_call_operand.vmem [shape: f32[2,9,16], index: 2, kind: output, shape index: {0}]   ;;  %s1586_s3 = inlined_call_operand.hbm [shape: f32[2,4,1,16], index: 3, kind: output, shape index: {1}]  }
   0x1   :  { %1590 = sst [smem:[#allocation14_spill]] %s1583_s0 }
   0x2   :  { %9 = vsyncpa [#allocation3], 0 }
   0x3   :  { %11 = vsyncpa [#allocation3 + $0x1], 0 }
   0x4   :  { %12 = vsyncpa [#allocation6], 0 }
   0x5   :  { %14 = vsyncpa [#allocation6 + $0x1], 0 }
   0x6   :  { %15 = vsyncpa [#allocation4], 0 }
   0x7   :  { %17 = vsyncpa [#allocation4 + $0x1], 0  ;;  %s1142_s12 = smov 0   ;;  %s1144_s13 = smov 0  }
   0x8   :  { %s1146_s14 = smov 0   ;;  %s1148_s15 = smov 0  }
   0x9   :  { %s1150_s16 = smov 0   ;;  %s1152_s17 = smov 0  }
   0xa   :  { %s1154_s18 = smov 0   ;;  %s1156_s19 = smov 0  }
   0xb LB: > { %1591 = sst [smem:[#allocation11_spill]] %s1111_s18  ;;  %s835_s20 = sadd.s32 4294967295, %s1115_s19   ;;  %s1115_s19 = sphi %s1156_s19, %s23_s19   ;;  %s1111_s18 = sphi %s1154_s18, %s1602_s18   ;;  %s1107_s17 = sphi %s1152_s17, %s1607_s17   ;;  %s1103_s16 = sphi %s1150_s16, %s1600_s16   ;;  %s1099_s15 = sphi %s1148_s15, %s1606_s15   ;;  %s1095_s14 = sphi %s1146_s14, %s1605_s14   ;;  %s1091_s13 = sphi %s1144_s13, %s1604_s13   ;;  %s1087_s12 = sphi %s1142_s12, %s1603_s12  }
   0xc   : > { %s836_s21 = sadd.s32 4294967294, %s1115_s19   ;;  %s32_s22 = sadd.s32 1, %s1107_s17 }
   0xd   : > { %s35_s23 = sadd.s32 1, %s1111_s18  ;;  %p33_p0 = scmp.ge.s32.totalorder %s32_s22, 4 }
   0xe   : > { %s44_s24 = sadd.s32 1, %s1095_s14  ;;  %p51_p1 = scmp.ne.s32.totalorder %s1095_s14, %s1091_s13 }
   0xf   : > { %p52_p2 = scmp.eq.s32.totalorder %s1115_s19, 0  ;;  %s1609_s22 = smov (%p33_p0, %s32_s22), 0 }
  0x10   : > { %1592 = sst [smem:[#allocation12_spill]] %s1609_s22  ;;  %s1611_s23 = smov (!%p33_p0, %s35_s23), %s1111_s18 }
  0x11   : > { %s40_s25 = ssub.s32 %s1107_s17, %s1609_s22  ;;  %p1195_p3 = por %p52_p2, %p51_p1 }
  0x12   : > { %p37_p4 = scmp.ge.s32.totalorder %s1611_s23, 2  ;;  %p57_p5 = scmp.ne.s32.totalorder %s1091_s13, %s1087_s12 }
  0x13   : > { %p58_p6 = scmp.eq.s32.totalorder %s835_s20, 0  ;;  %p137_p7 = scmp.eq.s32.totalorder %s835_s20, 7 }
  0x14   : > { %s1613_s23 = smov (%p37_p4, %s1611_s23), 0  ;;  %p143_p10 = scmp.eq.s32.totalorder %s836_s21, 7 }
  0x15   : > { %1594 = sst [smem:[#allocation13_spill]] %s1613_s23  ;;  %p1203_p8 = por %p58_p6, %p57_p5 }
  0x16   : > { %p1207_p9 = por %p137_p7, %p51_p1  ;;  %s39_s29 = ssub.s32 %s1111_s18, %s1613_s23 }
  0x17   : > { %s41_s30 = sor.u32 %s40_s25, %s39_s29  ;;  %p1213_p12 = por %p143_p10, %p57_p5 }
  0x18   : > { %p42_p11 = scmp.eq.s32.totalorder %s41_s30, 0  ;;  %p874_p13 = scmp.lt.s32.totalorder %s1115_s19, 8 }
  0x19   : > { %s1219_s5 = sand.u32 1, %s1095_s14   ;;  %s840_s8 = sshll.u32 %s1107_s17, 1 }
  0x1a   : > { %s1222_s6 = scalar_select %p42_p11, %s1095_s14, %s44_s24  }
  0x1b   : > { %s839_s7 = sshll.u32 %s1219_s5, 4  ;;  %s841_s9 = sshll.u32 %s1111_s18, 3 }
  0x1c   : > { %s167_s10 = scalar_lea.vmem [#allocation2], %s839_s7  ;;  %s172_s20 = sadd.s32 %s841_s9, %s840_s8 }
  0x1d   : > { %s177_s11 = sshll.u32 %s167_s10, 4  ;;  %s842_s21 = sshll.u32 %s172_s20, 3  ;;  %s178_s11 = int_to_ptr.vmem [resolvable:$true] %s177_s11 }
  0x1e   : > { %p1229_p0 = pnand %p874_p13, %p1195_p3  ;;  %s1599_s0 = sld [smem:[#allocation14_spill]] }
  0x1f   : > { %s164_s22 = scalar_lea.sflag [#allocation3], %s1219_s5  ;;  %s1117_s18 = smov 128  }
  0x20   : > { %s1118_s10 = smov 8   ;;  %p847_p1 = scmp.ge.s32.totalorder %s1115_s19, 1 }
  0x21   : > { %p209_p2 = scmp.lt.s32.totalorder %s1115_s19, 9  ;;  %s198_s9 = scalar_lea.hbm %s1584_s1, %s842_s21 }
  0x22   : > { %s199_s20 = sshll.u32 %s198_s9, 4  ;;  %s191_s29 = scalar_lea.vmem [#allocation5], %s839_s7  ;;  %s200_s20 = int_to_ptr.hbm [resolvable:$true] %s199_s20 }
  0x23   : > { %p210_p3 = pnand %p847_p1, %p209_p2  ;;  %s201_s30 = sshll.u32 %s191_s29, 4  ;;  %s202_s30 = int_to_ptr.vmem [resolvable:$true] %s201_s30 }
  0x24   : > { %s174_s24 = scalar_lea.hbm %s1599_s0, %s842_s21  ;;  %s1248_s0 = sand.u32 (!%p210_p3), 1, %s1091_s13  }
  0x25   : > { %s175_s23 = sshll.u32 %s174_s24, 4  ;;  %s188_s24 = scalar_lea.sflag [#allocation6], %s1219_s5  ;;  %s176_s23 = int_to_ptr.hbm [resolvable:$true] %s175_s23 }
  0x26   : > { %866 = dma.hbm_to_vmem [thread:$0]  (!%p1229_p0), %s176_s23, 256, %s178_s11, %s164_s22, %s1117_s18, %s1117_s18, %s1118_s10  }
  0x27   : > { %869 = dma.hbm_to_vmem [thread:$0]  (!%p1229_p0), %s200_s20, 256, %s202_s30, %s188_s24, %s1117_s18, %s1117_s18, %s1118_s10  }
  0x28   : > { %213 = sbr.rel (%p210_p3) target bundleno = 267 (0x10b), region = 28  ;;  %s848_s22 = sshll.u32 (!%p210_p3), %s1248_s0, 4 }
  0x29   : > { %s216_s23 = scalar_lea.sflag (!%p210_p3), [#allocation3], %s1248_s0  ;;  %s219_s11 = scalar_lea.vmem (!%p210_p3), [#allocation2], %s848_s22 }
  0x2d   : > { %1074 = dma.done.wait (%p1203_p8), %s216_s23, 256  }
  0x2e   : > { %1076 = vsyncadd (%p1203_p8), %s216_s23, 4294967040  ;;  %s226_s5 = scalar_lea.sflag [#allocation6], %s1248_s0  ;;  %s229_s7 = scalar_lea.vmem [#allocation5], %s848_s22 }
  0x2f   : > { %1078 = dma.done.wait (%p1203_p8), %s226_s5, 256  }
  0x30   : > { %1080 = vsyncadd (%p1203_p8), %s226_s5, 4294967040  ;;  %v1261_v0 = vld [vmem:[%s229_s7] sm:$0xff]  ;;  %s1119_s18 = smov 1   ;;  %s1120_s21 = smov 127   ;;  %v1273_v4 = vld [vmem:[%s229_s7 + $0x8] sm:$0xff]  ;;  %vm561_vm1 = vcmask 130048  }
  0x31   : > { %v1263_v1 = vld [vmem:[%s219_s11] sm:$0xff]  ;;  %299 = vrot.lane.b32.xlu2 %v1261_v0, %s1120_s21  ;;  %v1275_v5 = vld [vmem:[%s219_s11 + $0x8] sm:$0xff]  ;;  %p262_p4 = scmp.lt.s32.totalorder %s1103_s16, 1  ;;  %vm294_vm3 = vcmask 7168   ;;  %vm285_vm4 = vcmask 121856   ;;  %vm341_vm9 = vcmask 1040384  }
  0x32   : > { %288 = vrot.lane.b32.xlu1 %v1263_v1, %s1119_s18  ;;  %v1268_v2 = vsub.f32 %v1263_v1, %v1261_v0  ;;  %279 = vrot.lane.b32.xlu0 %v1263_v1, %s1120_s21  ;;  %v1283_v7 = vsub.f32 %v1275_v5, %v1273_v4  ;;  %vm535_vm5 = vcmp.gt.f32.partialorder %v1261_v0, 0.7  ;;  %vm549_vm6 = vcmp.le.f32.partialorder %v1261_v0, 0.2  ;;  %s261_s9 = scalar_lea.vmem [#allocation7], %s1248_s0  ;;  %p852_p5 = scmp.ne.s32.totalorder %s1099_s15, 0 }
  0x33   : > { %s263_s27 = scalar_select %p262_p4, %s1103_s16, 1  ;;  %vm553_vm7 = vcmp.ge.f32.partialorder %v1261_v0, 0.8  ;;  %v321_v27 = vmul.f32 2.0, %v1263_v1  ;;  %vm536_vm8 = vcmp.gt.f32.partialorder %v1273_v4, 0.7 }
  0x34   : > { %v275_v3 = vand.u32 2147483647, %v1268_v2  ;;  %v1279_v6 = vmul.f32 %v1268_v2, %v1268_v2  ;;  %v276_v9 = vand.u32 2147483647, %v1283_v7  ;;  %v1289_v10 = vmul.f32 %v1283_v7, %v1283_v7 }
  0x35   : > { %s856_s25 = sshll.u32 %s263_s27, 4  ;;  %vm550_vm10 = vcmp.le.f32.partialorder %v1273_v4, 0.2  ;;  %vm554_vm11 = vcmp.ge.f32.partialorder %v1273_v4, 0.8  ;;  %v322_v41 = vmul.f32 2.0, %v1275_v5 }
  0x36   : > { %vm557_vm0 = vcmp.gt.f32.partialorder %v275_v3, 0.1  ;;  %vm558_vm2 = vcmp.gt.f32.partialorder %v276_v9, 0.1  ;;  %s1306_s8 = scalar_lea.vmem %s1585_s2, %s856_s25  ;;  %v537_v28 = vsel %vm535_vm5, %v1279_v6, 0.0  ;;  %v551_v29 = vsel %vm549_vm6, %v1279_v6, 0.0 }
  0x37   : > { %v559_v8 = vsel %vm557_vm0, %v1279_v6, 0.0  ;;  %v560_v12 = vsel %vm558_vm2, %v1289_v10, 0.0  ;;  %v555_v30 = vsel %vm553_vm7, %v1279_v6, 0.0  ;;  %v562_v32 = vsel %vm561_vm1, %v1279_v6, 0.0 }
  0x38   : > { %v634_v11 = vsel %vm561_vm1, %v559_v8, 0.0  ;;  %v635_v13 = vsel %vm561_vm1, %v560_v12, 0.0  ;;  %v571_v33 = vsel %vm561_vm1, %v275_v3, 0.0  ;;  %v580_v34 = vsel %vm561_vm1, %v537_v28, 0.0 }
  0x39   : > { %301 = vrot.lane.b32.xlu2 %v1273_v4, %s1120_s21  ;;  %v636_v14 = vadd.f32 %v635_v13, %v634_v11  ;;  %v616_v37 = vsel %vm561_vm1, %v551_v29, 0.0  ;;  %v625_v38 = vsel %vm561_vm1, %v555_v30, 0.0  ;;  %v538_v39 = vsel %vm536_vm8, %v1289_v10, 0.0 }
  0x3a   : > { %290 = vrot.lane.b32.xlu1 %v1275_v5, %s1119_s18  ;;  %281 = vrot.lane.b32.xlu0 %v1275_v5, %s1120_s21  ;;  %v552_v43 = vsel %vm550_vm10, %v1289_v10, 0.0  ;;  %v556_v44 = vsel %vm554_vm11, %v1289_v10, 0.0  ;;  %v563_v47 = vsel %vm561_vm1, %v1289_v10, 0.0  ;;  %v572_v51 = vsel %vm561_vm1, %v276_v9, 0.0 }
  0x3b   : > { %v637_v15 = vrot.slane %v636_v14, 4  ;;  %v581_v52 = vsel %vm561_vm1, %v538_v39, 0.0  ;;  %vm352_vm12 = vcmask 1046528   ;;  %v617_v58 = vsel %vm561_vm1, %v552_v43, 0.0 }
  0x3c   : > { %vm644_vm8 = vcmask 1041408   ;;  %vm646_vm10 = vcmask 1042432   ;;  %vm648_vm11 = vcmask 1043456  }
  0x3d   : > { %v638_v16 = vadd.f32 %v637_v15, %v636_v14 }
  0x3f   : > { %v639_v17 = vrot.slane %v638_v16, 2 }
  0x41   : > { %v640_v18 = vadd.f32 %v639_v17, %v638_v16 }
  0x42   : > { %309 = vrot.lane.b32.xlu1 %v1273_v4, %s1119_s18  ;;  %307 = vrot.lane.b32.xlu0 %v1261_v0, %s1119_s18 }
  0x43   : > { %v641_v19 = vrot.slane %v640_v18, 1 }
  0x45   : > { %v1299_v20 = vadd.f32 %v641_v19, %v640_v18 }
  0x8b   : > { %v1318_v31 = vpop.permute.xlu2 %299 }
  0x93   : > { %v302_v14 = vpop.permute.xlu2 %301 }
  0x94   : > { %v306_v29 = vsel %vm285_vm4, %v302_v14, 0.0 }
  0xa4   : > { %v289_v21 = vpop.permute.xlu1 %288  ;;  %v280_v22 = vpop.permute.xlu0 %279 }
  0xa5   : > { %v295_v23 = vsel %vm294_vm3, 0.0, %v289_v21  ;;  %v286_v24 = vsel %vm285_vm4, %v280_v22, 0.0 }
  0xa6   : > { %v315_v25 = vsub.f32 %v286_v24, %v295_v23  ;;  %v319_v26 = vadd.f32 %v295_v23, %v286_v24 }
  0xa8   : > { %v323_v35 = vadd.f32 %v321_v27, %v319_v26  ;;  %v342_v36 = vrot.slane %v315_v25, 7  ;;  %v348_v48 = vmul.f32 2.0, %v315_v25  ;;  %v353_v59 = vrot.slane %v315_v25, 1 }
  0xa9   : > { %v626_v25 = vsel %vm561_vm1, %v556_v44, 0.0  ;;  %v1351_v27 = vadd.f32 %v563_v47, %v562_v32  ;;  %v1354_v28 = vadd.f32 %v319_v26, %v1263_v1  ;;  %v328_v32 = vmul.f32 2.0, %v1273_v4 }
  0xaa   : > { %v347_v53 = vsel %vm341_vm9, 0.0, %v342_v36  ;;  %v369_v54 = vrot.slane %v323_v35, 7  ;;  %v363_v60 = vrot.slane %v323_v35, 1  ;;  %v1364_v1 = vadd.f32 %v581_v52, %v580_v34 }
  0xab   : > { %v350_v62 = vadd.f32 %v348_v48, %v347_v53  ;;  %v1366_v26 = vadd.f32 %v617_v58, %v616_v37  ;;  %v477_v47 = vrot.slane %v1354_v28, 7  ;;  %v327_v34 = vmul.f32 2.0, %v1261_v0 }
  0xac   : > { %v291_v40 = vpop.permute.xlu1 %290  ;;  %v282_v42 = vpop.permute.xlu0 %281  ;;  %v374_v9 = vsel %vm341_vm9, 0.0, %v369_v54  ;;  %v485_v58 = vrot.slane %v1354_v28, 1 }
  0xad   : > { %v296_v45 = vsel %vm294_vm3, 0.0, %v291_v40  ;;  %v287_v46 = vsel %vm285_vm4, %v282_v42, 0.0  ;;  %v1357_v40 = vadd.f32 %v572_v51, %v571_v33  ;;  %v565_v33 = vrot.slane %v1351_v27, 4 }
  0xae   : > { %v316_v49 = vsub.f32 %v287_v46, %v296_v45  ;;  %v320_v50 = vadd.f32 %v296_v45, %v287_v46  ;;  %v1368_v45 = vadd.f32 %v626_v25, %v625_v38  ;;  %v305_v51 = vsel %vm285_vm4, %v1318_v31, 0.0 }
  0xb0   : > { %v324_v55 = vadd.f32 %v322_v41, %v320_v50  ;;  %v343_v56 = vrot.slane %v316_v49, 7  ;;  %v349_v57 = vmul.f32 2.0, %v316_v49  ;;  %v354_v61 = vrot.slane %v316_v49, 1 }
  0xb1   : > { %v1348_v19 = vadd.f32 %v320_v50, %v1275_v5  ;;  %v574_v50 = vrot.slane %v1357_v40, 4  ;;  %v628_v31 = vrot.slane %v1368_v45, 4 }
  0xb2   : > { %v344_v63 = vsel %vm341_vm9, %v342_v36, %v343_v56  ;;  %v364_v3 = vrot.slane %v324_v55, 1  ;;  %v370_v8 = vrot.slane %v324_v55, 7  ;;  %v355_v12 = vsel %vm352_vm12, %v353_v59, %v354_v61 }
  0xb3   : > { %v351_v11 = vadd.f32 %v349_v57, %v344_v63  ;;  %v358_v13 = vsel %vm352_vm12, %v354_v61, 0.0  ;;  %v359_v15 = vadd.f32 %v355_v12, %v350_v62  ;;  %v478_v43 = vrot.slane %v1348_v19, 7 }
  0xb4   : > { %v365_v16 = vsel %vm352_vm12, %v363_v60, %v364_v3  ;;  %v368_v17 = vsel %vm352_vm12, %v364_v3, 0.0  ;;  %v371_v18 = vsel %vm341_vm9, %v369_v54, %v370_v8  ;;  %v310_v24 = vpop.permute.xlu1 %309  ;;  %v308_v41 = vpop.permute.xlu0 %307  ;;  %v486_v38 = vrot.slane %v1348_v19, 1 }
  0xb5   : > { %v360_v21 = vadd.f32 %v358_v13, %v351_v11  ;;  %v375_v22 = vsub.f32 %v365_v16, %v374_v9  ;;  %v376_v23 = vsub.f32 %v368_v17, %v371_v18  ;;  %v413_v30 = vmul.f32 %v359_v15, %v359_v15 }
  0xb6   : > { %v314_v5 = vsel %vm294_vm3, 0.0, %v310_v24  ;;  %v313_v49 = vsel %vm294_vm3, 0.0, %v308_v41  ;;  %v479_v37 = vsel %vm341_vm9, %v477_v47, %v478_v43  ;;  %v583_v57 = vrot.slane %v1364_v1, 4 }
  0xb7   : > { %v414_v35 = vmul.f32 %v360_v21, %v360_v21  ;;  %v415_v36 = vmul.f32 %v375_v22, %v375_v22  ;;  %v416_v39 = vmul.f32 %v376_v23, %v376_v23  ;;  %v326_v44 = vadd.f32 %v314_v5, %v306_v29 }
  0xb8   : > { %v318_v48 = vsub.f32 %v306_v29, %v314_v5  ;;  %v336_v53 = vmax.f32 %v306_v29, %v314_v5  ;;  %v317_v55 = vsub.f32 %v305_v51, %v313_v49  ;;  %v325_v56 = vadd.f32 %v313_v49, %v305_v51 }
  0xb9   : > { %v1360_v42 = vadd.f32 %v415_v36, %v413_v30  ;;  %v1370_v46 = vadd.f32 %v416_v39, %v414_v35  ;;  %v330_v52 = vadd.f32 %v328_v32, %v326_v44  ;;  %v1384_v54 = vadd.f32 %v326_v44, %v1273_v4 }
  0xba   : > { %v390_v59 = vrot.slane %v318_v48, 1  ;;  %v482_v60 = vsel %vm341_vm9, 0.0, %v477_v47  ;;  %v1391_v61 = vadd.f32 %v479_v37, %v1348_v19  ;;  %v380_v62 = vrot.slane %v318_v48, 7 }
  0xbb   : > { %945 = vrsqrt.f32 %v1360_v42  ;;  %v329_v63 = vadd.f32 %v327_v34, %v325_v56  ;;  %v487_v3 = vsel %vm352_vm12, %v485_v58, %v486_v38  ;;  %v1397_v8 = vmax.f32 %v336_v53, %v1273_v4 }
  0xbc   : > { %947 = vrsqrt.f32 %v1370_v46  ;;  %v386_v9 = vmul.f32 2.0, %v318_v48  ;;  %v400_v11 = vrot.slane %v330_v52, 1  ;;  %v406_v13 = vrot.slane %v330_v52, 7 }
  0xbd   : > { %v496_v14 = vrot.slane %v1384_v54, 7  ;;  %v379_v15 = vrot.slane %v317_v55, 7  ;;  %v385_v16 = vmul.f32 2.0, %v317_v55  ;;  %v394_v17 = vsel %vm352_vm12, %v390_v59, 0.0 }
  0xbe   : > { %v333_v18 = vadd.f32 %v325_v56, %v1261_v0  ;;  %v389_v21 = vrot.slane %v317_v55, 1  ;;  %v399_v22 = vrot.slane %v329_v63, 1  ;;  %v335_v24 = vmax.f32 %v305_v51, %v313_v49 }
  0xbf   : > { %v381_v25 = vsel %vm341_vm9, %v379_v15, %v380_v62  ;;  %v384_v29 = vsel %vm341_vm9, 0.0, %v379_v15  ;;  %v405_v30 = vrot.slane %v329_v63, 7  ;;  %v404_v36 = vsel %vm352_vm12, %v400_v11, 0.0 }
  0xc0   : > { %v387_v39 = vadd.f32 %v385_v16, %v384_v29  ;;  %v388_v5 = vadd.f32 %v386_v9, %v381_v25  ;;  %v391_v41 = vsel %vm352_vm12, %v389_v21, %v390_v59  ;;  %v401_v43 = vsel %vm352_vm12, %v399_v22, %v400_v11 }
  0xc1   : > { %v1399_v12 = vpop.eup %945  ;;  %v407_v32 = vsel %vm341_vm9, %v405_v30, %v406_v13  ;;  %v410_v44 = vsel %vm341_vm9, 0.0, %v405_v30  ;;  %v504_v34 = vrot.slane %v1384_v54, 1  ;;  %v337_v37 = vmax.f32 %v335_v24, %v1261_v0 }
  0xc2   : > { %v1404_v23 = vpop.eup %947  ;;  %v420_v35 = vmul.f32 %v1399_v12, %v1360_v42  ;;  %v395_v48 = vadd.f32 %v391_v41, %v387_v39  ;;  %v396_v49 = vadd.f32 %v394_v17, %v388_v5  ;;  %v411_v51 = vsub.f32 %v401_v43, %v410_v44 }
  0xc3   : > { %v432_v47 = vmul.f32 %v1404_v23, %v1370_v46  ;;  %v412_v52 = vsub.f32 %v404_v36, %v407_v32  ;;  %v495_v53 = vrot.slane %v333_v18, 7  ;;  %v526_v62 = vrot.slane %v1397_v8, 1 }
  0xc4   : > { %v421_v55 = vmul.f32 %v1399_v12, %v420_v35  ;;  %v443_v56 = vmul.f32 %v395_v48, %v395_v48  ;;  %v444_v58 = vmul.f32 %v396_v49, %v396_v49  ;;  %v445_v59 = vmul.f32 %v411_v51, %v411_v51 }
  0xc5   : > { %v446_v63 = vmul.f32 %v412_v52, %v412_v52  ;;  %v497_v9 = vsel %vm341_vm9, %v495_v53, %v496_v14  ;;  %v500_v11 = vsel %vm341_vm9, 0.0, %v495_v53  ;;  %v433_v13 = vmul.f32 %v1404_v23, %v432_v47 }
  0xc6   : > { %v520_v15 = vrot.slane %v1397_v8, 7  ;;  %v1425_v16 = vadd.f32 %v445_v59, %v443_v56  ;;  %v503_v17 = vrot.slane %v333_v18, 1  ;;  %v501_v22 = vadd.f32 %v500_v11, %v333_v18 }
  0xc7   : > { %v1427_v21 = vadd.f32 %v446_v63, %v444_v58  ;;  %v502_v24 = vadd.f32 %v497_v9, %v1384_v54  ;;  %v519_v25 = vrot.slane %v337_v37, 7  ;;  %v1433_v29 = vadd.f32 %v565_v33, %v1351_v27 }
  0xc8   : > { %v483_v14 = vadd.f32 %v482_v60, %v1354_v28  ;;  %v422_v30 = vmul.f32 0.5, %v421_v55  ;;  %949 = vrsqrt.f32 %v1425_v16  ;;  %v1440_v35 = vadd.f32 %v574_v50, %v1357_v40 }
  0xc9   : > { %v490_v54 = vsel %vm352_vm12, %v486_v38, 0.0  ;;  %v530_v18 = vsel %vm352_vm12, %v526_v62, 0.0  ;;  %951 = vrsqrt.f32 %v1427_v21  ;;  %v434_v27 = vmul.f32 0.5, %v433_v13 }
  0xca   : > { %v491_v33 = vadd.f32 %v487_v3, %v483_v14  ;;  %v508_v28 = vsel %vm352_vm12, %v504_v34, 0.0  ;;  %v505_v60 = vsel %vm352_vm12, %v503_v17, %v504_v34  ;;  %v492_v36 = vadd.f32 %v490_v54, %v1391_v61 }
  0xcb   : > { %v509_v39 = vadd.f32 %v505_v60, %v501_v22  ;;  %v510_v5 = vadd.f32 %v508_v28, %v502_v24  ;;  %v521_v40 = vsel %vm341_vm9, %v519_v25, %v520_v15  ;;  %v423_v50 = vsub.f32 1.5, %v422_v30 }
  0xcc   : > { %v524_v19 = vsel %vm341_vm9, 0.0, %v519_v25  ;;  %v525_v38 = vrot.slane %v337_v37, 1  ;;  %v532_v41 = vmax.f32 %v521_v40, %v530_v18  ;;  %v567_v43 = vrot.slane %v1433_v29, 2 }
  0xcd   : > { %v1456_v3 = vadd.f32 %v583_v57, %v1364_v1  ;;  %v511_v32 = vsub.f32 %v491_v33, %v509_v39  ;;  %v512_v44 = vsub.f32 %v492_v36, %v510_v5  ;;  %v576_v61 = vrot.slane %v1440_v35, 2 }
  0xce   : > { %v950_v47 = vpop.eup %949  ;;  %v435_v48 = vsub.f32 1.5, %v434_v27  ;;  %v527_v49 = vsel %vm352_vm12, %v525_v38, %v526_v62  ;;  %v534_v51 = vmax.f32 %v532_v41, %v1397_v8  ;;  %v424_v58 = vmul.f32 %v1399_v12, %v423_v50 }
  0xcf   : > { %v952_v34 = vpop.eup %951  ;;  %v450_v52 = vmul.f32 %v950_v47, %v1425_v16  ;;  %v513_v53 = vmul.f32 0.11111111, %v511_v32  ;;  %v514_v55 = vmul.f32 0.11111111, %v512_v44  ;;  %v531_v56 = vmax.f32 %v524_v19, %v527_v49 }
  0xd0   : > { %vm426_vm13 = vcmp.eq.f32.partialorder %v1360_v42, inf  ;;  %v462_v1 = vmul.f32 %v952_v34, %v1427_v21  ;;  %v544_v57 = vmul.f32 0.8, %v534_v51  ;;  %vm428_vm14 = vcmp.eq.f32.partialorder %v1360_v42, 0.0 }
  0xd1   : > { %v451_v59 = vmul.f32 %v950_v47, %v450_v52  ;;  %v515_v63 = vsub.f32 %v1268_v2, %v513_v53  ;;  %v516_v62 = vsub.f32 %v1283_v7, %v514_v55  ;;  %v533_v9 = vmax.f32 %v531_v56, %v337_v37 }
  0xd2   : > { %v436_v8 = vmul.f32 %v1404_v23, %v435_v48  ;;  %v463_v11 = vmul.f32 %v952_v34, %v462_v1  ;;  %vm546_vm15 = vcmp.gt.f32.partialorder %v1273_v4, %v544_v57  ;;  %v425_v22 = vmul.f32 %v424_v58, %v1360_v42 }
  0xd3   : > { %v452_v13 = vmul.f32 0.5, %v451_v59  ;;  %v541_v12 = vmul.f32 %v515_v63, %v515_v63  ;;  %v542_v15 = vmul.f32 %v516_v62, %v516_v62  ;;  %v543_v17 = vmul.f32 0.8, %v533_v9 }
  0xd4   : > { %v429_v24 = vand.u32 2147483648, %v1360_v42  ;;  %v464_v25 = vmul.f32 0.5, %v463_v11  ;;  %v548_v14 = vsel %vm546_vm15, %v1289_v10, 0.0  ;;  %v437_v4 = vmul.f32 %v436_v8, %v1370_v46 }
  0xd5   : > { %v453_v30 = vsub.f32 1.5, %v452_v13  ;;  %vm545_vm0 = vcmp.gt.f32.partialorder %v1261_v0, %v543_v17  ;;  %v598_v37 = vsel %vm561_vm1, %v541_v12, 0.0  ;;  %v599_v23 = vsel %vm561_vm1, %v542_v15, 0.0 }
  0xd6   : > { %v465_v54 = vsub.f32 1.5, %v464_v25  ;;  %v547_v18 = vsel %vm545_vm0, %v1279_v6, 0.0  ;;  %v608_v27 = vsel %vm561_vm1, %v548_v14, 0.0  ;;  %vm438_vm2 = vcmp.eq.f32.partialorder %v1370_v46, inf }
  0xd7   : > { %vm440_vm3 = vcmp.eq.f32.partialorder %v1370_v46, 0.0  ;;  %v454_v33 = vmul.f32 %v950_v47, %v453_v30  ;;  %v607_v10 = vsel %vm561_vm1, %v547_v18, 0.0  ;;  %v427_v0 = vsel %vm426_vm13, %v1360_v42, %v425_v22 }
  0xd8   : > { %v441_v28 = vand.u32 2147483648, %v1370_v46  ;;  %v466_v60 = vmul.f32 %v952_v34, %v465_v54  ;;  %v600_v36 = vadd.f32 %v599_v23, %v598_v37  ;;  %vm456_vm4 = vcmp.eq.f32.partialorder %v1425_v16, inf }
  0xd9   : > { %v455_v39 = vmul.f32 %v454_v33, %v1425_v16  ;;  %vm458_vm5 = vcmp.eq.f32.partialorder %v1425_v16, 0.0  ;;  %v609_v6 = vadd.f32 %v608_v27, %v607_v10  ;;  %v439_v5 = vsel %vm438_vm2, %v1370_v46, %v437_v4 }
  0xda   : > { %v459_v40 = vand.u32 2147483648, %v1425_v16  ;;  %v467_v50 = vmul.f32 %v466_v60, %v1427_v21  ;;  %vm468_vm6 = vcmp.eq.f32.partialorder %v1427_v21, inf  ;;  %v430_v19 = vsel %vm428_vm14, %v429_v24, %v427_v0 }
  0xdb   : > { %v457_v38 = vsel %vm456_vm4, %v1425_v16, %v455_v39  ;;  %vm470_vm7 = vcmp.eq.f32.partialorder %v1427_v21, 0.0  ;;  %v471_v41 = vand.u32 2147483648, %v1427_v21  ;;  %v601_v47 = vrot.slane %v600_v36, 4 }
  0xdc   : > { %v460_v32 = vsel %vm458_vm5, %v459_v40, %v457_v38  ;;  %v469_v44 = vsel %vm468_vm6, %v1427_v21, %v467_v50  ;;  %v619_v48 = vrot.slane %v1366_v26, 4  ;;  %v442_v49 = vsel %vm440_vm3, %v441_v28, %v439_v5 }
  0xdd   : > { %v472_v51 = vsel %vm470_vm7, %v471_v41, %v469_v44  ;;  %v473_v34 = vsub.f32 %v430_v19, %v460_v32  ;;  %v610_v52 = vrot.slane %v609_v6, 4  ;;  %v585_v53 = vrot.slane %v1456_v3, 2 }
  0xde   : > { %v474_v42 = vsub.f32 %v442_v49, %v472_v51  ;;  %v568_v16 = vadd.f32 %v567_v43, %v1433_v29  ;;  %v577_v21 = vadd.f32 %v576_v61, %v1440_v35  ;;  %v602_v58 = vadd.f32 %v601_v47, %v600_v36 }
  0xdf   : > { %v539_v55 = vmul.f32 %v473_v34, %v473_v34  ;;  %v620_v46 = vadd.f32 %v619_v48, %v1366_v26  ;;  %v611_v57 = vadd.f32 %v610_v52, %v609_v6  ;;  %v629_v59 = vadd.f32 %v628_v31, %v1368_v45 }
  0xe0   : > { %v540_v56 = vmul.f32 %v474_v42, %v474_v42  ;;  %v586_v63 = vadd.f32 %v585_v53, %v1456_v3  ;;  %v569_v43 = vrot.slane %v568_v16, 1  ;;  %v578_v62 = vrot.slane %v577_v21, 1 }
  0xe1   : > { %v589_v1 = vsel %vm561_vm1, %v539_v55, 0.0  ;;  %v603_v35 = vrot.slane %v602_v58, 2  ;;  %v621_v61 = vrot.slane %v620_v46, 2  ;;  %v612_v11 = vrot.slane %v611_v57, 2 }
  0xe2   : > { %v590_v29 = vsel %vm561_vm1, %v540_v56, 0.0  ;;  %v630_v13 = vrot.slane %v629_v59, 2  ;;  %v587_v26 = vrot.slane %v586_v63, 1  ;;  %v570_v12 = vadd.f32 %v569_v43, %v568_v16 }
  0xe3   : > { %v591_v9 = vadd.f32 %v590_v29, %v589_v1  ;;  %v579_v15 = vadd.f32 %v578_v62, %v577_v21  ;;  %v604_v22 = vadd.f32 %v603_v35, %v602_v58  ;;  %v622_v24 = vadd.f32 %v621_v61, %v620_v46 }
  0xe4   : > { %v613_v45 = vadd.f32 %v612_v11, %v611_v57  ;;  %v631_v31 = vadd.f32 %v630_v13, %v629_v59  ;;  %v588_v3 = vadd.f32 %v587_v26, %v586_v63  ;;  %vm650_vm13 = vcmask 1044480  }
  0xe5   : > { %v592_v8 = vrot.slane %v591_v9, 4  ;;  %v643_v14 = vsel %vm341_vm9, %v570_v12, %v579_v15  ;;  %v605_v37 = vrot.slane %v604_v22, 1  ;;  %v623_v23 = vrot.slane %v622_v24, 1 }
  0xe6   : > { %v614_v54 = vrot.slane %v613_v45, 1  ;;  %v632_v18 = vrot.slane %v631_v31, 1  ;;  %v645_v27 = vsel %vm644_vm8, %v643_v14, %v588_v3  ;;  %vm652_vm14 = vcmask 1045504  }
  0xe7   : > { %v593_v17 = vadd.f32 %v592_v8, %v591_v9  ;;  %v606_v10 = vadd.f32 %v605_v37, %v604_v22  ;;  %v624_v0 = vadd.f32 %v623_v23, %v622_v24 }
  0xe8   : > { %v615_v28 = vadd.f32 %v614_v54, %v613_v45  ;;  %v633_v60 = vadd.f32 %v632_v18, %v631_v31 }
  0xe9   : > { %v594_v25 = vrot.slane %v593_v17, 2 }
  0xeb   : > { %v595_v30 = vadd.f32 %v594_v25, %v593_v17 }
  0xed   : > { %v596_v4 = vrot.slane %v595_v30, 1 }
  0xef   : > { %v597_v33 = vadd.f32 %v596_v4, %v595_v30 }
  0xf1   : > { %v647_v36 = vsel %vm646_vm10, %v645_v27, %v597_v33  ;;  %658 = sbr.rel (%p852_p5) target bundleno = 249 (0xf9), region = 40 }
  0xf2   : > { %v649_v39 = vsel %vm648_vm11, %v647_v36, %v606_v10 }
  0xf3   : > { %v651_v6 = vsel %vm650_vm13, %v649_v39, %v615_v28 }
  0xf4   : > { %v653_v5 = vsel %vm652_vm14, %v651_v6, %v624_v0 }
  0xf5   : > { %v654_v40 = vsel %vm352_vm12, %v653_v5, %v633_v60 }
  0xf6   : > { %vm660_vm9 = vcmask 122880   ;;  %v1121_v50 = vmov 0.0  }
  0xf7   : > { %659 = vst.msk [vmem:[%s1306_s8] sm:$0xff] %vm561_vm1, %v1121_v50 }
  0xf8   : > { %661 = vst.msk [vmem:[%s1306_s8 + $0x8] sm:$0x1] %vm660_vm9, %v1121_v50 }
  0xf9 PF: > { %v669_v19 = vsel %vm561_vm1, %v1268_v2, 0.0  ;;  %v670_v38 = vsel %vm561_vm1, %v1283_v7, 0.0  ;;  %vm667_vm12 = vcmask 122880   ;;  %s853_s20 = sshll.u32 %s1103_s16, 2  ;;  %s700_s23 = sshll.u32 %s261_s9, 4  ;;  %s701_s23 = int_to_ptr.vmem [resolvable:$true] %s700_s23 }
  0xfa   : > { %v671_v44 = vadd.f32 %v670_v38, %v669_v19  ;;  %s697_s29 = sadd.s32 %s1099_s15, %s853_s20  ;;  %s685_s16 = scalar_lea.sflag [#allocation4], %s1248_s0 }
  0xfb   : > { %s698_s22 = scalar_lea.hbm %s1586_s3, %s697_s29  ;;  %s1033_s21 = scalar_lea.hbm %s1586_s3, 8 }
  0xfc   : > { %v672_v49 = vrot.slane %v671_v44, 4  ;;  %s702_s11 = sshll.u32 %s698_s22, 4  ;;  %s703_s11 = int_to_ptr.hbm [resolvable:$true] %s702_s11 }
  0xfd   : > { %s1027_s15 = sshra.s32 %s703_s11, 4  ;;  %s1028_s15 = int_to_ptr.hbm [resolvable:$true] %s1027_s15 }
  0xfe   : > { %v662_v41 = vld [vmem:[%s1306_s8] sm:$0xff]  ;;  %v673_v2 = vadd.f32 %v672_v49, %v671_v44  ;;  %s1029_s5 = scalar_lea.hbm %s1028_s15, 1  ;;  %p1034_p10 = scmp.lt.s32.totalorder %s1028_s15, %s1586_s3 }
  0xff   : > { %v663_v32 = vld [vmem:[%s1306_s8 + $0x8] sm:$0x1]  ;;  %v664_v47 = vadd.f32 %v662_v41, %v654_v40  ;;  %p1030_p6 = scmp.ne.s32.totalorder %s1028_s15, %s1029_s5  ;;  %p1035_p11 = scmp.lt.s32.totalorder %s1033_s21, %s1029_s5 }
 0x100   : > { %v665_v48 = vadd.f32 %v663_v32, %v1299_v20  ;;  %v674_v7 = vrot.slane %v673_v2, 2 }
 0x101   : > { %666 = vst.msk [vmem:[%s1306_s8] sm:$0xff] %vm561_vm1, %v664_v47  ;;  %p1031_p7 = pnand %p1030_p6, %p1207_p9  ;;  %p1036_p13 = por %p1035_p11, %p1034_p10 }
 0x102   : > { %668 = vst.msk [vmem:[%s1306_s8 + $0x8] sm:$0x1] %vm667_vm12, %v665_v48  ;;  %v675_v51 = vadd.f32 %v674_v7, %v673_v2 }
 0x103   : > { %p1032_p8 = pneg %p1031_p7 }
 0x104   : > { %v676_v20 = vrot.slane %v675_v51, 1 }
 0x105   : > { %p1037_p0 = pnand %p1036_p13, %p1032_p8 }
 0x106   : > { %v677_v34 = vadd.f32 %v676_v20, %v675_v51 }
 0x108   : > { %678 = vst.msk [vmem:[%s261_s9] sm:$0x1] %vm667_vm12, %v677_v34 }
 0x109   : > { %1040 = shalt.err (!%p1037_p0)
}
 0x10a   : > { %861 = dma.vmem_to_hbm [thread:$0]  (%p1207_p9), %s701_s23, 16, %s703_s11, %s685_s16  }
 0x10b PF: > { %p875_p1 = scmp.ge.s32.totalorder %s1115_s19, 2  ;;  %s722_s0 = sand.u32 1, %s1087_s12  }
 0x10c   : > { %s723_s10 = scalar_lea.sflag [#allocation4], %s722_s0 }
 0x10d   : > { %p871_p2 = pnand %p875_p1, %p1213_p12 }
 0x10f   : > { %p872_p3 = pneg %p871_p2 }
 0x111   : > { %1082 = dma.done.wait (%p872_p3), %s723_s10, 16  }
 0x112   : > { %1084 = vsyncadd (%p872_p3), %s723_s10, 4294967280  ;;  %s23_s19 = sadd.s32 1, %s1115_s19   ;;  %s1600_s16 = sld [smem:[#allocation11_spill]] }
 0x113   : > { %p20_p4 = scmp.ge.s32.totalorder %s23_s19, 10   ;;  %s1601_s28 = sld [smem:[#allocation12_spill]] }
 0x114   : > { %s1602_s18 = sld [smem:[#allocation13_spill]]  ;;  %s1603_s12 = smov %s1091_s13 }
 0x115   : > { %s1604_s13 = smov %s1095_s14  ;;  %s1605_s14 = smov %s1222_s6 }
 0x116   : > { %s1606_s15 = smov %s1107_s17  ;;  %22 = sbr.rel (!%p20_p4) target bundleno = 11 (0xb), region = 102 }
 0x119   : > { %s1607_s17 = smov %s1601_s28 }
 0x11b   :  { %728 = vsyncpa [#allocation3], 1 }
 0x11c   :  { %730 = vsyncpa [#allocation3 + $0x1], 1 }
 0x11d   :  { %731 = vsyncpa [#allocation6], 1 }
 0x11e   :  { %733 = vsyncpa [#allocation6 + $0x1], 1 }
 0x11f   :  { %734 = vsyncpa [#allocation4], 1 }
 0x120   :  { %736 = vsyncpa [#allocation4 + $0x1], 1 }

</bundles_post_ra>
